<compile_context>
chip_gen: v7x
topology: tpu7x:2x2x1
jax: 0.10.0
libtpu: 0.0.40
codegen_flags: <defaults>
</compile_context>

<pallas_src>
import functools

import jax
import jax.numpy as jnp
from jax import lax
from jax.experimental import pallas as pl
from jax.experimental.pallas import tpu as pltpu


def _round_up(n, m):
    return ((n + m - 1) // m) * m


def _vmem_capacity_bytes():
    """Physical VMEM per TensorCore (chip-aware; conservative fallback = v7x 64 MiB)."""
    try:
        info = pltpu.get_tpu_info()
        cap = getattr(info, "vmem_capacity_bytes", None)
        if cap:
            return int(cap)
    except Exception:
        pass
    return 64 << 20


# ---------------------------------------------------------------------------
# Pallas kernel: one block of Tm Fourier modes per grid step.
# ---------------------------------------------------------------------------
def _spectral_mul_kernel(x_ref, w_ref, o_ref):
    # x_ref: (Tm, Bp, Cin2p)    bf16, packed [xr | xi | 0...]
    # w_ref: (Tm, Cin2p, Cout2p) bf16, packed [[wr, wi], [-wi, wr]] (zero-padded)
    # o_ref: (Tm, Bp, Cout2p)   f32,  packed [or | oi | 0...]
    # Per-mode real matmul on the MXU with f32 accumulation; batch dim = mode.
    o_ref[...] = lax.dot_general(
        x_ref[...],
        w_ref[...],
        dimension_numbers=(((2,), (1,)), ((0,), (0,))),
        preferred_element_type=jnp.float32,
    ).astype(o_ref.dtype)


def _spectral_mul(x_pack, w_pack, mode_tile):
    """x_pack: (modes_p, Bp, cin2p) bf16, w_pack: (modes_p, cin2p, cout2p) bf16
       -> (modes_p, Bp, cout2p) f32"""
    modes_p, Bp, cin2p = x_pack.shape
    cout2p = w_pack.shape[-1]
    assert modes_p % mode_tile == 0

    out_bytes = modes_p * Bp * cout2p * 4
    flops = 2 * modes_p * Bp * cin2p * cout2p
    bytes_accessed = (x_pack.size * x_pack.dtype.itemsize
                      + w_pack.size * w_pack.dtype.itemsize
                      + out_bytes)

    vmem_cap = _vmem_capacity_bytes()
    vmem_limit = int(min(vmem_cap * 3 // 4, 96 << 20))

    return pl.pallas_call(
        _spectral_mul_kernel,
        out_shape=jax.ShapeDtypeStruct((modes_p, Bp, cout2p), jnp.float32),
        grid_spec=pltpu.PrefetchScalarGridSpec(
            num_scalar_prefetch=0,
            grid=(modes_p // mode_tile,),
            in_specs=[
                pl.BlockSpec((mode_tile, Bp, cin2p), lambda m: (m, 0, 0)),
                pl.BlockSpec((mode_tile, cin2p, cout2p), lambda m: (m, 0, 0)),
            ],
            out_specs=pl.BlockSpec((mode_tile, Bp, cout2p), lambda m: (m, 0, 0)),
        ),
        compiler_params=pltpu.CompilerParams(
            dimension_semantics=("parallel",),
            vmem_limit_bytes=vmem_limit,
        ),
        cost_estimate=pl.CostEstimate(
            flops=flops, transcendentals=0, bytes_accessed=bytes_accessed),
    )(x_pack, w_pack)


# ---------------------------------------------------------------------------
# Parameter-time packing / tile choice (hoisted out of the forward path).
# ---------------------------------------------------------------------------
def choose_mode_tile(modes1, Bp, cin2p, cout2p,
                     in_itemsize=2, out_itemsize=4, vmem_frac=0.40):
    """Modes-per-block such that the double-buffered working set fits comfortably
    in this chip's VMEM (chip-aware), while keeping >= 2 grid steps so both v7x
    TensorCores get work along the parallel mode axis."""
    budget = int(_vmem_capacity_bytes() * vmem_frac)

    def block_bytes(t):  # x + w + out blocks, double-buffered
        return 2 * t * (Bp * cin2p * in_itemsize
                        + cin2p * cout2p * in_itemsize
                        + Bp * cout2p * out_itemsize)

    tm = 1024
    while tm > 1 and block_bytes(tm) > budget:
        tm //= 2
    tm = min(tm, max(1, -(-modes1 // 2)))   # >= 2 grid steps when modes1 > 1
    return max(1, tm)


def pack_spectral_weights(weights_r, weights_i, mode_tile, dtype=jnp.bfloat16):
    """(Cin, Cout, modes1) real/imag -> (modes_p, cin2p, cout2p) packed weights.

    W_pack[m] = [[wr, wi], [-wi, wr]] so that [xr | xi] @ W_pack = [or | oi].
    Channels are zero-padded to lane multiples of 128 (lane-dense stores, aligned
    MXU K/N); modes padded to a multiple of mode_tile.  All padding is zero so
    padded outputs are exactly zero and discarded."""
    cin, cout, modes1 = weights_r.shape
    wr = jnp.transpose(weights_r, (2, 0, 1)).astype(jnp.float32)  # (modes, Cin, Cout)
    wi = jnp.transpose(weights_i, (2, 0, 1)).astype(jnp.float32)
    top = jnp.concatenate([wr, wi], axis=-1)        # (modes, Cin, 2*Cout)
    bot = jnp.concatenate([-wi, wr], axis=-1)       # (modes, Cin, 2*Cout)
    w_pack = jnp.concatenate([top, bot], axis=1)    # (modes, 2*Cin, 2*Cout)

    modes_p = _round_up(modes1, mode_tile)
    cin2p = _round_up(2 * cin, 128)
    cout2p = _round_up(2 * cout, 128)
    w_pack = jnp.pad(w_pack, ((0, modes_p - modes1),
                              (0, cin2p - 2 * cin),
                              (0, cout2p - 2 * cout)))
    return w_pack.astype(dtype)


# ---------------------------------------------------------------------------
# Forward pass.
# ---------------------------------------------------------------------------
@functools.partial(jax.jit, static_argnames=("out_channels", "modes1", "mode_tile"))
def spectral_conv1d(x, w_pack, *, out_channels, modes1, mode_tile):
    """x: (B, Cin, N) f32 ; w_pack: (modes_p, cin2p, cout2p) bf16
       returns (B, Cout, N) f32."""
    B, Cin, N = x.shape
    modes_p, cin2p, cout2p = w_pack.shape
    Cout = out_channels
    n_freq = N // 2 + 1
    Bp = _round_up(B, 16)   # bf16 sublane packing -> full vregs on the MXU M dim

    # FFT (glue). TODO(synk): rfft/irfft have no clean Pallas equivalent; kept in XLA.
    x_ft = jnp.fft.rfft(x, axis=-1)[:, :, :modes1]                       # (B, Cin, modes1) c64

    # Pack real/imag mode-major, zero-pad to (modes_p, Bp, cin2p), cast bf16.
    x_pack = jnp.concatenate([jnp.real(x_ft), jnp.imag(x_ft)], axis=1)   # (B, 2Cin, modes1)
    x_pack = jnp.transpose(x_pack, (2, 0, 1))                            # (modes1, B, 2Cin)
    x_pack = jnp.pad(x_pack, ((0, modes_p - modes1),
                              (0, Bp - B),
                              (0, cin2p - 2 * Cin))).astype(w_pack.dtype)

    # Pallas: per-mode complex multiply as one fused real MXU matmul per mode tile.
    o_pack = _spectral_mul(x_pack, w_pack, mode_tile)                    # (modes_p, Bp, cout2p) f32

    out_r = o_pack[:modes1, :B, :Cout]
    out_i = o_pack[:modes1, :B, Cout:2 * Cout]
    out_low = jnp.transpose(out_r + 1j * out_i, (1, 2, 0)).astype(jnp.complex64)  # (B, Cout, modes1)

    # Zero high modes via pad (no zeros+scatter), then inverse FFT (glue).
    out_ft = jnp.pad(out_low, ((0, 0), (0, 0), (0, n_freq - modes1)))
    return jnp.fft.irfft(out_ft, n=N, axis=-1).astype(jnp.float32)


if __name__ == "__main__":
    # Small deterministic problem: B=2, Cin=4, Cout=4, N=16, modes1=4
    B, Cin, Cout, N, modes1 = 2, 4, 4, 16, 4
    key = jax.random.PRNGKey(0)
    kx, kwr, kwi = jax.random.split(key, 3)

    x = jax.random.normal(kx, (B, Cin, N), dtype=jnp.float32)

    # Mimic: scale * torch.rand(Cin, Cout, modes1, dtype=cfloat)
    scale = 1.0 / (Cin * Cout)
    weights_r = scale * jax.random.uniform(kwr, (Cin, Cout, modes1), dtype=jnp.float32)
    weights_i = scale * jax.random.uniform(kwi, (Cin, Cout, modes1), dtype=jnp.float32)

    # Hoisted, done once: chip-aware tile pick and weight packing.
    Bp = _round_up(B, 16)
    cin2p = _round_up(2 * Cin, 128)
    cout2p = _round_up(2 * Cout, 128)
    mode_tile = choose_mode_tile(modes1, Bp, cin2p, cout2p)
    w_pack = pack_spectral_weights(weights_r, weights_i, mode_tile)

    y = spectral_conv1d(x, w_pack, out_channels=Cout, modes1=modes1, mode_tile=mode_tile)
    y = jax.block_until_ready(y)

    # Pure-JAX f32 reference of the full forward.
    w_c = (weights_r + 1j * weights_i).astype(jnp.complex64)
    x_ft = jnp.fft.rfft(x, axis=-1)
    out_low_ref = jnp.einsum("bix,iox->box", x_ft[:, :, :modes1], w_c)
    out_ft_ref = jnp.zeros((B, Cout, N // 2 + 1), dtype=jnp.complex64)
    out_ft_ref = out_ft_ref.at[:, :, :modes1].set(out_low_ref)
    y_ref = jnp.fft.irfft(out_ft_ref, n=N, axis=-1)

    assert y.shape == (B, Cout, N)
    # bf16 inputs / f32 accumulate: tolerance ~1e-2 scale.
    assert jnp.allclose(y, y_ref, atol=3e-2, rtol=3e-2), float(jnp.max(jnp.abs(y - y_ref)))

    print("KERNEL_OK")
</pallas_src>

<mosaic_0001>
module attributes {stable_mosaic.version = 11 : i64} {
  func.func @_spectral_mul_kernel(%arg0: i32, %arg1: memref<2x16x128xbf16, #tpu.memory_space<vmem>>, %arg2: memref<2x128x128xbf16, #tpu.memory_space<vmem>>, %arg3: memref<2x16x128xf32, #tpu.memory_space<vmem>>) attributes {dimension_semantics = [#tpu.dimension_semantics<parallel>], iteration_bounds = array<i64: 2>, scalar_prefetch = 0 : i64, scratch_operands = 0 : i64, tpu.core_type = #tpu.core_type<tc>, window_params = [{transform_indices = @transform_0, window_bounds = array<i64: 2, 16, 128>}, {transform_indices = @transform_1, window_bounds = array<i64: 2, 128, 128>}, {transform_indices = @transform_2, window_bounds = array<i64: 2, 16, 128>}]} {
    %c0 = arith.constant 0 : index
    %c0_0 = arith.constant 0 : index
    %c0_1 = arith.constant 0 : index
    %0 = vector.load %arg1[%c0, %c0_0, %c0_1] : memref<2x16x128xbf16, #tpu.memory_space<vmem>>, vector<2x16x128xbf16>
    %c0_2 = arith.constant 0 : index
    %c0_3 = arith.constant 0 : index
    %c0_4 = arith.constant 0 : index
    %1 = vector.load %arg2[%c0_2, %c0_3, %c0_4] : memref<2x128x128xbf16, #tpu.memory_space<vmem>>, vector<2x128x128xbf16>
    %cst = arith.constant dense<0.000000e+00> : vector<2x16x128xf32>
    %2 = tpu.matmul %0, %1, %cst {dimension_numbers = #tpu.dot_dimension_numbers<[2], [1], [1], [2], [0, 0, 0, 1, 1, 2], [0], [0]>} : vector<2x16x128xbf16>, vector<2x128x128xbf16>, vector<2x16x128xf32> -> vector<2x16x128xf32>
    %c0_5 = arith.constant 0 : index
    %c0_6 = arith.constant 0 : index
    %c0_7 = arith.constant 0 : index
    %3 = vector.load %arg3[%c0_5, %c0_6, %c0_7] : memref<2x16x128xf32, #tpu.memory_space<vmem>>, vector<2x16x128xf32>
    tpu.vector_store %arg3[%c0_5, %c0_6, %c0_7], %2 {strides = array<i32>} : memref<2x16x128xf32, #tpu.memory_space<vmem>>, vector<2x16x128xf32>,
    return
  }
  func.func @transform_0(%arg0: i32) -> (i32, i32, i32) {
    %c0_i32 = arith.constant 0 : i32
    %c0_i32_0 = arith.constant 0 : i32
    %c0_i32_1 = arith.constant 0 : i32
    return %arg0, %c0_i32, %c0_i32_0 : i32, i32, i32
  }
  func.func @transform_1(%arg0: i32) -> (i32, i32, i32) {
    %c0_i32 = arith.constant 0 : i32
    %c0_i32_0 = arith.constant 0 : i32
    %c0_i32_1 = arith.constant 0 : i32
    return %arg0, %c0_i32, %c0_i32_0 : i32, i32, i32
  }
  func.func @transform_2(%arg0: i32) -> (i32, i32, i32) {
    %c0_i32 = arith.constant 0 : i32
    %c0_i32_0 = arith.constant 0 : i32
    %c0_i32_1 = arith.constant 0 : i32
    return %arg0, %c0_i32, %c0_i32_0 : i32, i32, i32
  }
}

</mosaic_0001>

<bundles_post_ra>
// kernel: reverse.1
= control target key start
LH: loop header
LB: loop body
LE: loop exit
PB: predicated region body
PF: predicated region fallthrough
CT: control target
= control target key end

     0   :  { %s92_s0 = inlined_call_operand.vmem [shape: f32[2,4,7], index: 0, kind: input, shape index: {}]   ;;  %s93_s1 = inlined_call_operand.vmem [shape: f32[2,4,7], index: 1, kind: output, shape index: {}]  }
   0x1   :  { %v28_v0 = vld [vmem:[%s92_s0 + $0xc] sm:$0x3]  ;;  %v29_v1 = vld [vmem:[%s92_s0 + $0xa] sm:$0x3]  ;;  %v31_v2 = vld [vmem:[%s92_s0 + $0x8] sm:$0x3] }
   0x2   :  { %4 = vst [vmem:[%s93_s1] sm:$0x3] %v28_v0  ;;  %30 = vst [vmem:[%s93_s1 + $0x2] sm:$0x3] %v29_v1  ;;  %v33_v3 = vld [vmem:[%s92_s0 + $0x6] sm:$0x3] }
   0x3   :  { %32 = vst [vmem:[%s93_s1 + $0x4] sm:$0x3] %v31_v2  ;;  %v35_v4 = vld [vmem:[%s92_s0 + $0x4] sm:$0x3]  ;;  %v37_v5 = vld [vmem:[%s92_s0 + $0x2] sm:$0x3] }
   0x4   :  { %34 = vst [vmem:[%s93_s1 + $0x6] sm:$0x3] %v33_v3  ;;  %36 = vst [vmem:[%s93_s1 + $0x8] sm:$0x3] %v35_v4  ;;  %v25_v6 = vld [vmem:[%s92_s0] sm:$0x3] }
   0x5   :  { %38 = vst [vmem:[%s93_s1 + $0xa] sm:$0x3] %v37_v5  ;;  %39 = vst [vmem:[%s93_s1 + $0xc] sm:$0x3] %v25_v6 }

// kernel: spectral_conv1d.1
= control target key start
LH: loop header
LB: loop body
LE: loop exit
PB: predicated region body
PF: predicated region fallthrough
CT: control target
= control target key end

     0   :  { %7 = vsyncpa [#allocation3], 0  ;;  %s883_s0 = inlined_call_operand.vmem [shape: bf16[4,16,128], index: 0, kind: input, shape index: {}]   ;;  %s884_s1 = inlined_call_operand.hbm [shape: bf16[4,128,128], index: 1, kind: input, shape index: {}]   ;;  %s885_s2 = inlined_call_operand.vmem [shape: f32[4,16,128], index: 2, kind: output, shape index: {}]  }
   0x1   :  { %9 = vsyncpa [#allocation3 + $0x1], 0  ;;  %s751_s9 = smov 0   ;;  %s753_s10 = smov 0  }
   0x2   :  { %s755_s11 = smov 0   ;;  %s757_s12 = smov 0  }
   0x3 LB: > { %s506_s13 = sadd.s32 4294967295, %s729_s12   ;;  %s771_s14 = sadd.s32 1, %s729_s12   ;;  %s729_s12 = sphi %s757_s12, %s892_s12   ;;  %s725_s11 = sphi %s755_s11, %s891_s11   ;;  %s721_s10 = sphi %s753_s10, %s890_s10   ;;  %s717_s9 = sphi %s751_s9, %s889_s9  }
   0x4   : > { %s45_s15 = ssub.s32 %s729_s12, %s771_s14  ;;  %s48_s16 = sadd.s32 1, %s725_s11 }
   0x5   : > { %p46_p0 = scmp.eq.s32.totalorder %s45_s15, 0  ;;  %p55_p1 = scmp.ne.s32.totalorder %s725_s11, %s721_s10 }
   0x6   : > { %p56_p2 = scmp.eq.s32.totalorder %s729_s12, 0  ;;  %p61_p3 = scmp.ne.s32.totalorder %s721_s10, %s717_s9 }
   0x7   : > { %s781_s17 = scalar_select %p46_p0, %s725_s11, %s48_s16  }
   0x8   : > { %p57_p4 = por %p56_p2, %p55_p1  ;;  %p62_p5 = scmp.eq.s32.totalorder %s506_s13, 0 }
   0x9   : > { %p610_p6 = scmp.lt.s32.totalorder %s729_s12, 2  ;;  %s121_s19 = sand.u32 1, %s725_s11  }
   0xa   : > { %p786_p7 = por %p62_p5, %p61_p3  ;;  %s510_s20 = sshll.u32 %s121_s19, 7 }
   0xb   : > { %s543_s21 = sshll.u32 %s729_s12, 11  ;;  %s125_s25 = scalar_lea.vmem [#allocation2], %s510_s20 }
   0xc   : > { %s795_s24 = scalar_lea.hbm %s884_s1, %s543_s21  ;;  %s133_s26 = sshll.u32 %s125_s25, 4  ;;  %s797_s26 = int_to_ptr.vmem [resolvable:$true] %s133_s26 }
   0xd   : > { %p799_p8 = pnand %p610_p6, %p57_p4  ;;  %s804_s28 = scalar_lea.sflag [#allocation3], %s121_s19 }
   0xe   : > { %s665_s29 = scalar_lea.hbm %s795_s24, 2048  ;;  %s670_s4 = scalar_lea.hbm %s884_s1, 4096 }
   0xf   : > { %p666_p10 = scmp.ne.s32.totalorder %s795_s24, %s665_s29  ;;  %p667_p11 = pneg %p799_p8 }
  0x10   : > { %p671_p0 = scmp.lt.u32.totalorder %s795_s24, %s884_s1  ;;  %p672_p1 = scmp.lt.u32.totalorder %s670_s4, %s665_s29 }
  0x11   : > { %p668_p12 = pnand %p667_p11, %p666_p10  ;;  %p674_p3 = scmp.lt.u32.totalorder %s665_s29, %s795_s24 }
  0x12   : > { %p673_p2 = por %p672_p1, %p671_p0 }
  0x13   : > { %p669_p13 = pneg %p668_p12 }
  0x14   : > { %p675_p4 = por %p674_p3, %p673_p2 }
  0x16   : > { %p676_p5 = pnand %p675_p4, %p669_p13 }
  0x18   : > { %679 = shalt.err (!%p676_p5)
}
  0x19   : > { %s680_s7 = scalar_lea.vmem %s797_s26, 2048  ;;  %s731_s8 = smov [#allocation2]  }
  0x1a   : > { %p681_p6 = scmp.ne.s32.totalorder %s797_s26, %s680_s7  ;;  %s685_s9 = sshll.u32 %s731_s8, 4  ;;  %s686_s9 = int_to_ptr.vmem [resolvable:$false] %s685_s9 }
  0x1b   : > { %s687_s15 = scalar_lea.vmem %s686_s9, 4096  ;;  %p688_p9 = scmp.lt.s32.totalorder %s797_s26, %s686_s9 }
  0x1c   : > { %p683_p10 = pnand %p681_p6, %p667_p11  ;;  %p689_p0 = scmp.lt.s32.totalorder %s687_s15, %s680_s7 }
  0x1e   : > { %p684_p12 = pneg %p683_p10  ;;  %p690_p1 = por %p689_p0, %p688_p9 }
  0x20   : > { %p691_p2 = pnand %p690_p1, %p684_p12 }
  0x22   : > { %694 = shalt.err (!%p691_p2)
}
  0x23   : > { %s732_s16 = smov 64   ;;  %s733_s19 = smov 4  }
  0x24   : > { %609 = dma.hbm_to_vmem [thread:$0]  (!%p799_p8), %s795_s24, 2048, %s797_s26, %s804_s28, %s732_s16, %s732_s16, %s733_s19  }
  0x25   : > { %p141_p11 = scmp.lt.s32.totalorder %s729_s12, 3  ;;  %p888_p13 = scmp.ge.s32.totalorder %s729_s12, 1 }
  0x27   : > { %p142_p3 = pnand %p888_p13, %p141_p11 }
  0x28   : > { %s147_s20 = sand.u32 (!%p142_p3), 1, %s721_s10  }
  0x29   : > { %145 = sbr.rel (%p142_p3) target bundleno = 298 (0x12a), region = 28  ;;  %s515_s21 = sshll.u32 (!%p142_p3), %s147_s20, 7 }
  0x2a   : > { %s148_s22 = scalar_lea.sflag (!%p142_p3), [#allocation3], %s147_s20  ;;  %s836_s23 = scalar_lea.vmem (!%p142_p3), [#allocation2], %s515_s21 }
  0x30   : > { %712 = dma.done.wait (%p786_p7), %s148_s22, 2048  }
  0x31   : > { %714 = vsyncadd (%p786_p7), %s148_s22, 4294965248  ;;  %v734_v0 = vmov 0.0   ;;  %vm735_vm0 = vmmov 0   ;;  %v647_v1 = vld [vmem:[%s836_s23] sm:$0xff]   ;;  %s516_s24 = sshll.u32 %s506_s13, 1  ;;  %v649_v3 = vld [vmem:[%s836_s23 + $0x8] sm:$0xff]  }
  0x32   : > { %564 = vmatprep.subr.bf16.mxu0 %v734_v0  ;;  %584 = vmatprep.subr.bf16.mxu1 %v734_v0  ;;  %v648_v2 = vld [vmem:[%s836_s23 + $0x40] sm:$0xff]   ;;  %v650_v4 = vld [vmem:[%s836_s23 + $0x48] sm:$0xff]   ;;  %p180_p7 = scmp.lt.s32.totalorder %s516_s24, 3  ;;  %v651_v5 = vld [vmem:[%s836_s23 + $0x10] sm:$0xff]  }
  0x33   : > { %580 = vmatprep.mubr.msk.bf16.mxu0 %vm735_vm0, %v734_v0  ;;  %600 = vmatprep.mubr.msk.bf16.mxu1 %vm735_vm0, %v734_v0  ;;  %v652_v6 = vld [vmem:[%s836_s23 + $0x50] sm:$0xff]   ;;  %v653_v7 = vld [vmem:[%s836_s23 + $0x18] sm:$0xff]   ;;  %v655_v9 = vld [vmem:[%s836_s23 + $0x20] sm:$0xff]  }
  0x34   : > { %565 = vmatpush3.bf16.msra.mxu0 %v647_v1  ;;  %585 = vmatpush3.bf16.msra.mxu1 %v648_v2  ;;  %s894_s24 = smov (!%p180_p7, %s516_s24), 3  ;;  %v654_v8 = vld [vmem:[%s836_s23 + $0x58] sm:$0xff]   ;;  %v656_v10 = vld [vmem:[%s836_s23 + $0x60] sm:$0xff]   ;;  %v657_v11 = vld [vmem:[%s836_s23 + $0x28] sm:$0xff]  }
  0x35   : > { %566 = vmatprep.subr.bf16.mxu0 %v734_v0  ;;  %586 = vmatprep.subr.bf16.mxu1 %v734_v0  ;;  %s544_s12 = sshll.u32 %s894_s24, 3  ;;  %v658_v12 = vld [vmem:[%s836_s23 + $0x68] sm:$0xff]   ;;  %v659_v13 = vld [vmem:[%s836_s23 + $0x30] sm:$0xff]   ;;  %v661_v15 = vld [vmem:[%s836_s23 + $0x38] sm:$0xff]   ;;  %s545_s26 = sshll.u32 %s894_s24, 4 }
  0x36   : > { %s184_s25 = scalar_lea.vmem %s883_s0, %s544_s12  ;;  %v660_v14 = vld [vmem:[%s836_s23 + $0x70] sm:$0xff]   ;;  %v662_v16 = vld [vmem:[%s836_s23 + $0x78] sm:$0xff]   ;;  %s192_s29 = scalar_lea.vmem %s885_s2, %s545_s26 }
  0x37   : > { %v663_v17 = vld [vmem:[%s184_s25] sm:$0xff]   ;;  %v664_v18 = vld [vmem:[%s184_s25 + $0x8] sm:$0xff]  }
  0x38   : > { %567 = vmatpush3.bf16.msra.mxu0 %v649_v3  ;;  %587 = vmatpush3.bf16.msra.mxu1 %v650_v4 }
  0x39   : > { %568 = vmatprep.subr.bf16.mxu0 %v734_v0  ;;  %588 = vmatprep.subr.bf16.mxu1 %v734_v0 }
  0x3c   : > { %569 = vmatpush3.bf16.msra.mxu0 %v651_v5  ;;  %589 = vmatpush3.bf16.msra.mxu1 %v652_v6 }
  0x3d   : > { %570 = vmatprep.subr.bf16.mxu0 %v734_v0  ;;  %590 = vmatprep.subr.bf16.mxu1 %v734_v0 }
  0x40   : > { %571 = vmatpush3.bf16.msra.mxu0 %v653_v7  ;;  %591 = vmatpush3.bf16.msra.mxu1 %v654_v8 }
  0x41   : > { %572 = vmatprep.subr.bf16.mxu0 %v734_v0  ;;  %592 = vmatprep.subr.bf16.mxu1 %v734_v0 }
  0x44   : > { %573 = vmatpush3.bf16.msra.mxu0 %v655_v9  ;;  %593 = vmatpush3.bf16.msra.mxu1 %v656_v10 }
  0x45   : > { %574 = vmatprep.subr.bf16.mxu0 %v734_v0  ;;  %594 = vmatprep.subr.bf16.mxu1 %v734_v0 }
  0x48   : > { %575 = vmatpush3.bf16.msra.mxu0 %v657_v11  ;;  %595 = vmatpush3.bf16.msra.mxu1 %v658_v12 }
  0x49   : > { %576 = vmatprep.subr.bf16.mxu0 %v734_v0  ;;  %596 = vmatprep.subr.bf16.mxu1 %v734_v0 }
  0x4c   : > { %577 = vmatpush3.bf16.msra.mxu0 %v659_v13  ;;  %597 = vmatpush3.bf16.msra.mxu1 %v660_v14 }
  0x4d   : > { %578 = vmatprep.subr.bf16.mxu0 %v734_v0  ;;  %598 = vmatprep.subr.bf16.mxu1 %v734_v0 }
  0x50   : > { %579 = vmatpush3.bf16.msra.mxu0 %v661_v15  ;;  %599 = vmatpush3.bf16.msra.mxu1 %v662_v16 }
  0x53   : > { %581 = vmatmul.mubr.bf16.vlgmr.msra.gmra.mrb[0].mxu0 %v663_v17  ;;  %601 = vmatmul.mubr.bf16.vlgmr.msra.gmra.mrb[0].mxu1 %v664_v18 }
 0x126   : > { %v319_v19 = vpop.f32.mrb[0].mxu0  ;;  %v414_v20 = vpop.f32.mrb[0].mxu1 }
 0x127   : > { %421 = vst [vmem:[%s192_s29] sm:$0xff] %v319_v19  ;;  %v582_v21 = vpop.f32.mrb[1].mxu0  ;;  %423 = vst [vmem:[%s192_s29 + $0x10] sm:$0xff] %v414_v20  ;;  %v602_v22 = vpop.f32.mrb[1].mxu1 }
 0x128   : > { %v322_v23 = vpop.f32.mrb[2].mxu0  ;;  %v417_v24 = vpop.f32.mrb[2].mxu1 }
 0x129   : > { %422 = vst [vmem:[%s192_s29 + $0x8] sm:$0xff] %v322_v23  ;;  %v583_v25 = vpop.f32.mrb[3].mxu0  ;;  %424 = vst [vmem:[%s192_s29 + $0x18] sm:$0xff] %v417_v24  ;;  %v603_v26 = vpop.f32.mrb[3].mxu1 }
 0x12a PF: > { %p12_p8 = scmp.ge.s32.totalorder %s771_s14, 4   ;;  %s889_s9 = smov %s721_s10 }
 0x12b   : > { %s890_s10 = smov %s725_s11  ;;  %s891_s11 = smov %s781_s17 }
 0x12c   : > { %s892_s12 = smov %s771_s14  ;;  %14 = sbr.rel (!%p12_p8) target bundleno = 3 (0x3), region = 71 }
 0x133   :  { %449 = vsyncpa [#allocation3], 1 }
 0x134   :  { %451 = vsyncpa [#allocation3 + $0x1], 1 }

</bundles_post_ra>
